<compile_context>
chip_gen: v6e
topology: v6e:2x2x1
jax: 0.10.0
libtpu: 0.0.40
codegen_flags: <defaults>
</compile_context>

<pallas_src>
import jax
import jax.numpy as jnp
from jax.experimental import pallas as pl
from jax.experimental.pallas import tpu as pltpu


def _relu_kernel(x_ref, o_ref):
    # Elementwise ReLU on the whole VMEM tile (VPU only, native dtype).
    # Weak-typed 0 preserves dtype; NaN propagation matches torch.relu.
    o_ref[...] = jnp.maximum(x_ref[...], 0)


def _vmem_capacity_bytes() -> int:
    # TPU-generation-aware VMEM capacity (v5e/v6e: 128 MiB, v7x: 64 MiB/TC).
    try:
        cap = int(pltpu.get_tpu_info().vmem_capacity_bytes)
        if cap > 0:
            return cap
    except Exception:
        pass
    return 64 << 20  # conservative (v7x-level) fallback


def _sublane_packing(dtype) -> int:
    # Rows per packed 32-bit sublane group: f32 -> 8, bf16 -> 16, int8/fp8 -> 32.
    itemsize = jnp.dtype(dtype).itemsize
    return max(8, 32 // max(1, itemsize))


def relu_pallas(x: jax.Array, *, target_block_bytes: int = 8 << 20) -> jax.Array:
    """Elementwise ReLU via a Pallas TPU kernel. Matches torch.nn.functional.relu."""
    orig_shape = x.shape
    if x.ndim == 0 or x.size == 0:
        return jnp.maximum(x, 0)

    n = x.size
    itemsize = jnp.dtype(x.dtype).itemsize
    packing = _sublane_packing(x.dtype)
    vmem_cap = _vmem_capacity_bytes()

    # Per-block budget: double-buffered input + output = 4x block bytes, so
    # never let one block exceed ~1/8 of physical VMEM (8 MiB on v7x).
    block_budget = min(int(target_block_bytes), max(1 << 20, vmem_cap // 8))

    cost = pl.CostEstimate(flops=n, transcendentals=0,
                           bytes_accessed=2 * n * itemsize)

    # ---- Preferred path: lane-dense 2-D slab (width divides n exactly). ----
    width = None
    divisors = [w for w in (2048, 1024, 512, 256, 128) if n % w == 0]
    for w in divisors:  # prefer widths that give >= 8 rows (full sublane use)
        if n // w >= 8:
            width = w
            break
    if width is None and divisors:
        width = divisors[0]  # tiny array: any exact 128-multiple width

    if width is not None:
        rows = n // width
        x2d = x.reshape(rows, width)
        bytes_per_row = width * itemsize

        tile_rows = min(rows, max(1, block_budget // bytes_per_row))
        # Ensure >= 2 blocks when the array is big enough, so the "parallel"
        # axis shards across both TensorCores on v7x (no-op cost elsewhere).
        if tile_rows >= rows and rows >= 2 * packing:
            tile_rows = rows // 2
        if tile_rows < rows:
            tile_rows = max(packing, (tile_rows // packing) * packing)
        grid_rows = pl.cdiv(rows, tile_rows)

        block_bytes = tile_rows * width * itemsize
        vmem_limit = max(4 * block_bytes + (8 << 20), 16 << 20)
        vmem_limit = min(vmem_limit, (vmem_cap * 3) // 4)

        out2d = pl.pallas_call(
            _relu_kernel,
            out_shape=jax.ShapeDtypeStruct((rows, width), x.dtype),
            grid=(grid_rows,),
            in_specs=[pl.BlockSpec((tile_rows, width), lambda i: (i, 0))],
            out_specs=pl.BlockSpec((tile_rows, width), lambda i: (i, 0)),
            compiler_params=pltpu.CompilerParams(
                dimension_semantics=("parallel",),
                vmem_limit_bytes=int(vmem_limit),
            ),
            cost_estimate=cost,
        )(x2d)
        return out2d.reshape(orig_shape)

    # ---- Fallback: element count has no 128-multiple divisor. ----
    # Flatten to 1-D and tile lane-dense 1024-element-multiple chunks; the
    # final partial block is masked by Pallas.  Conservative chunk size keeps
    # the double-buffered footprint comfortably inside VMEM on every chip.
    x1d = x.reshape(n)
    chunk = min(n, max(1024, (1 << 20) // itemsize))
    chunk = max(1024, (chunk // 1024) * 1024)
    if chunk >= n:
        chunk = n  # single full-extent block (allowed even if not 128-aligned)
    grid_n = pl.cdiv(n, chunk)

    out1d = pl.pallas_call(
        _relu_kernel,
        out_shape=jax.ShapeDtypeStruct((n,), x.dtype),
        grid=(grid_n,),
        in_specs=[pl.BlockSpec((chunk,), lambda i: (i,))],
        out_specs=pl.BlockSpec((chunk,), lambda i: (i,)),
        compiler_params=pltpu.CompilerParams(
            dimension_semantics=("parallel",),
            vmem_limit_bytes=int(min((vmem_cap * 3) // 4, 48 << 20)),
        ),
        cost_estimate=cost,
    )(x1d)
    return out1d.reshape(orig_shape)


if __name__ == "__main__":
    key = jax.random.PRNGKey(0)
    # Small NCHW input consistent with the PyTorch module's forward.
    x = jax.random.normal(key, (2, 4, 16, 16), dtype=jnp.float32)

    y = relu_pallas(x)
    jax.block_until_ready(y)

    # Sanity check against the pure-JAX reference.
    y_ref = jnp.maximum(x, 0)
    assert y.shape == x.shape and y.dtype == x.dtype
    assert jnp.array_equal(y, y_ref)

    print("KERNEL_OK")
</pallas_src>

<mosaic_0001>
module attributes {stable_mosaic.version = 11 : i64} {
  func.func @_relu_kernel(%arg0: i32, %arg1: memref<8x256xf32, #tpu.memory_space<vmem>>, %arg2: memref<8x256xf32, #tpu.memory_space<vmem>>) attributes {dimension_semantics = [#tpu.dimension_semantics<parallel>], iteration_bounds = array<i64: 1>, scalar_prefetch = 0 : i64, scratch_operands = 0 : i64, tpu.core_type = #tpu.core_type<tc>, window_params = [{transform_indices = @transform_0, window_bounds = array<i64: 8, 256>}, {transform_indices = @transform_1, window_bounds = array<i64: 8, 256>}]} {
    %c0 = arith.constant 0 : index
    %c0_0 = arith.constant 0 : index
    %0 = vector.load %arg1[%c0, %c0_0] : memref<8x256xf32, #tpu.memory_space<vmem>>, vector<8x256xf32>
    %cst = arith.constant 0.000000e+00 : f32
    %1 = vector.broadcast %cst : f32 to vector<8x256xf32>
    %2 = arith.maximumf %0, %1 : vector<8x256xf32>
    %c0_1 = arith.constant 0 : index
    %c0_2 = arith.constant 0 : index
    %3 = vector.load %arg2[%c0_1, %c0_2] : memref<8x256xf32, #tpu.memory_space<vmem>>, vector<8x256xf32>
    tpu.vector_store %arg2[%c0_1, %c0_2], %2 {strides = array<i32>} : memref<8x256xf32, #tpu.memory_space<vmem>>, vector<8x256xf32>,
    return
  }
  func.func @transform_0(%arg0: i32) -> (i32, i32) {
    %c0_i32 = arith.constant 0 : i32
    %c0_i32_0 = arith.constant 0 : i32
    return %arg0, %c0_i32 : i32, i32
  }
  func.func @transform_1(%arg0: i32) -> (i32, i32) {
    %c0_i32 = arith.constant 0 : i32
    %c0_i32_0 = arith.constant 0 : i32
    return %arg0, %c0_i32 : i32, i32
  }
}

</mosaic_0001>

<bundles_post_ra>
// kernel: tpu_custom_call.1
= control target key start
LH: loop header
LB: loop body
LE: loop exit
PB: predicated region body
PF: predicated region fallthrough
CT: control target
= control target key end

     0   :  { %6 = vsyncpa [#allocation3], 0  ;;  %s106_s0 = inlined_call_operand.hbm [shape: f32[8,256], index: 0, kind: input, shape index: {}]   ;;  %s107_s1 = inlined_call_operand.hbm [shape: f32[8,256], index: 1, kind: output, shape index: {}]  }
   0x1   :  { %7 = vsyncpa [#allocation4], 0  ;;  %s88_s6 = smov [#allocation2]  }
   0x2   :  { %s14_s7 = sshll.u32 %s88_s6, 4  ;;  %s15_s7 = int_to_ptr.vmem [resolvable:$true] %s14_s7 }
   0x3   :  { %s52_s8 = scalar_lea.vmem %s15_s7, 256  ;;  %p57_p1 = scmp.lt.s32.totalorder %s15_s7, %s15_s7 }
   0x4   :  { %p53_p0 = scmp.ne.s32.totalorder %s15_s7, %s52_s8  ;;  %p58_p2 = scmp.lt.s32.totalorder %s52_s8, %s52_s8 }
   0x6   :  { %p59_p3 = por %p58_p2, %p57_p1 }
   0x8   :  { %p60_p4 = pnand %p59_p3, %p53_p0 }
   0xa   :  { %63 = shalt.err (!%p60_p4)
}
   0xb   :  { %17 = dma.hbm_to_vmem [thread:$0]  %s106_s0, 256, %s15_s7, [#allocation3]  }
   0xc   :  { %84 = dma.done.wait [#allocation3], 256  }
   0xd   :  { %85 = vsyncadd [#allocation3], 4294967040  ;;  %s89_s11 = smov [#allocation5]   ;;  %v21_v0 = vld [vmem:[#allocation2] sm:$0xff]  ;;  %v22_v1 = vld [vmem:[#allocation2 + $0x8] sm:$0xff] }
   0xe   :  { %s33_s12 = sshll.u32 %s89_s11, 4  ;;  %v23_v2 = vmax.f32 %v21_v0, 0.0  ;;  %v24_v3 = vmax.f32 %v22_v1, 0.0  ;;  %s34_s12 = int_to_ptr.vmem [resolvable:$true] %s33_s12 }
   0xf   :  { %s64_s13 = scalar_lea.vmem %s34_s12, 256  ;;  %p69_p6 = scmp.lt.s32.totalorder %s34_s12, %s34_s12 }
  0x10   :  { %25 = vst [vmem:[#allocation5] sm:$0xff] %v23_v2  ;;  %26 = vst [vmem:[#allocation5 + $0x8] sm:$0xff] %v24_v3  ;;  %p65_p5 = scmp.ne.s32.totalorder %s34_s12, %s64_s13  ;;  %p70_p7 = scmp.lt.s32.totalorder %s64_s13, %s64_s13 }
  0x12   :  { %p71_p8 = por %p70_p7, %p69_p6 }
  0x14   :  { %p72_p9 = pnand %p71_p8, %p65_p5 }
  0x16   :  { %75 = shalt.err (!%p72_p9)
}
  0x17   :  { %36 = dma.vmem_to_hbm [thread:$0]  %s34_s12, 256, %s107_s1, [#allocation4]  }
  0x18   :  { %86 = dma.done.wait [#allocation4], 256  }
  0x19   :  { %87 = vsyncadd [#allocation4], 4294967040 }
  0x1a   :  { %40 = vsyncpa [#allocation3], 1 }
  0x1b   :  { %41 = vsyncpa [#allocation4], 1 }

</bundles_post_ra>
